<compile_context>
chip_gen: v6e
topology: v6e:2x2x1
jax: 0.10.0
libtpu: 0.0.40
codegen_flags: <defaults>
</compile_context>

<pallas_src>
import math
import functools

import jax
import jax.numpy as jnp
from jax import lax
from jax.experimental import pallas as pl
from jax.experimental.pallas import tpu as pltpu


def _am_softmax_kernel(x_ref, wt_ref, label_ref, marg_ref, loss_ref,
                       xn_sc, m_sc, l_sc, t_sc, *, s, tc, mxu_dtype):
    """One (batch tile, class tile) grid step.

    x_ref    : (TB, F)  f32        input features (un-normalized, zero-padded F)
    wt_ref   : (F, TC)  mxu_dtype  pre-normalized, pre-transposed weights tile
    label_ref: (TB, 1)  i32        class labels
    marg_ref : (TB, 1)  f32        per-row margin (= exp(margin)[demog_label])
    loss_ref : (TB, 1)  f32        per-row CE (written on the last class tile)
    xn_sc    : (TB, F)  mxu_dtype  cached normalized x (written on class tile 0)
    m_sc/l_sc/t_sc : (TB, 1) f32   running max / running sum / target logit
    """
    j = pl.program_id(1)
    n_ct = pl.num_programs(1)

    @pl.when(j == 0)
    def _():
        # F.normalize(p=2, dim=1): x * rsqrt(max(||x||^2, 1e-24)) — computed
        # once per batch tile and cached so the C/tc class steps reuse it.
        x = x_ref[...].astype(jnp.float32)                               # (TB, F)
        inv_norm = lax.rsqrt(jnp.maximum(jnp.sum(x * x, axis=1, keepdims=True),
                                         1e-24))
        xn_sc[...] = (x * inv_norm).astype(mxu_dtype)
        m_sc[...] = jnp.full_like(m_sc, -jnp.inf)
        l_sc[...] = jnp.zeros_like(l_sc)
        t_sc[...] = jnp.zeros_like(t_sc)

    # cosine tile on the MXU: (TB, F) @ (F, TC) -> (TB, TC), f32 accumulate.
    cosine = jnp.dot(xn_sc[...], wt_ref[...],
                     preferred_element_type=jnp.float32)                 # (TB, TC)

    tb_, tc_ = cosine.shape
    # Compare the tile-local iota against (label - j*tc): shifts a (TB,1)
    # per-row scalar instead of adding j*tc to the whole (TB,TC) iota.
    local_ids = lax.broadcasted_iota(jnp.int32, (tb_, tc_), 1)
    is_target = local_ids == (label_ref[...] - j * tc)                   # (TB, TC)
    # TODO(synk): labels outside [0, C) (e.g. an ignore_index) are not masked
    # out; they never match and the row degenerates to plain logsumexp.

    # logits = s * (cosine - one_hot * exp(margin[demog]))
    logits = s * cosine - jnp.where(is_target, s * marg_ref[...], 0.0)

    # Online logsumexp across class tiles.
    tile_max = jnp.max(logits, axis=1, keepdims=True)
    m_new = jnp.maximum(m_sc[...], tile_max)
    alpha = jnp.exp(m_sc[...] - m_new)
    l_sc[...] = alpha * l_sc[...] + jnp.sum(jnp.exp(logits - m_new),
                                            axis=1, keepdims=True)
    m_sc[...] = m_new
    # Target logit lives in exactly one class tile; accumulate it online.
    t_sc[...] += jnp.sum(jnp.where(is_target, logits, 0.0),
                         axis=1, keepdims=True)

    @pl.when(j == n_ct - 1)
    def _():
        # per-row CE = logsumexp(logits) - logits[label]
        loss_ref[...] = m_sc[...] + jnp.log(l_sc[...]) - t_sc[...]


def am_softmax_marginatt_forward(x, weights, margin, label, demog_label,
                                 s=64.0, lambda_regular=100.0,
                                 tb=512, tc=2048, mxu_dtype=jnp.float32):
    """Returns (loss, temp) exactly like AM_Softmax_marginatt.forward."""
    B, F = x.shape
    C, F2 = weights.shape
    assert F == F2

    # --- glue (plain JAX, runs once) -------------------------------------
    temp = jnp.exp(margin)                                   # (ndemog,)
    marg_row = temp[demog_label].reshape(B, 1).astype(jnp.float32)
    label2d = label.astype(jnp.int32).reshape(B, 1)

    # Pre-normalize W once; pre-transpose to (F, C) so the kernel feeds the
    # MXU directly (no per-step renorm / in-kernel transpose).
    w_n = weights / jnp.maximum(
        jnp.sqrt(jnp.sum(weights * weights, axis=1, keepdims=True)), 1e-12)

    # Zero-pad the feature dim to a multiple of 128 (lane dim of the x tile,
    # sublane dim of the (F, tc) W tile). Zeros leave row norms and dot
    # products unchanged, but avoid masked/padded vector loads.
    if F % 128 != 0:
        f_pad = ((F + 127) // 128) * 128
        x = jnp.pad(x, ((0, 0), (0, f_pad - F)))
        w_n = jnp.pad(w_n, ((0, 0), (0, f_pad - F)))
    else:
        f_pad = F
    w_t = w_n.T.astype(mxu_dtype)                            # (f_pad, C)

    # --- tile sizing ------------------------------------------------------
    # NOTE(v7x): prefer tb <= B/2 so the "parallel" batch axis shards across
    # both TensorCores; on v5e/v6e (single TC) tb = B maximizes W reuse.
    tb = min(tb, B)
    tc = min(tc, C)
    assert B % tb == 0, "batch must be divisible by the batch tile"
    assert C % tc == 0, "nclasses must be divisible by the class tile"
    assert tb == B or tb % 8 == 0, "batch tile must be a multiple of 8"
    assert tc == C or tc % 128 == 0, "class tile must be a multiple of 128"

    # --- VMEM budget: request what we actually need (v7x has only 64 MiB) --
    itemsize = jnp.dtype(mxu_dtype).itemsize
    w_blk = f_pad * tc * itemsize              # W^T class tile
    x_blk = tb * f_pad * 4                     # f32 x tile
    small_blk = 3 * tb * 4                     # labels + margin + loss tiles
    scratch_bytes = tb * f_pad * itemsize + 3 * tb * 4
    footprint = 2 * (w_blk + x_blk + small_blk) + scratch_bytes   # double-buffered
    vmem_limit = int(min(max(footprint * 1.25 + (4 << 20), 16 << 20), 96 << 20))

    kernel = functools.partial(_am_softmax_kernel, s=float(s), tc=tc,
                               mxu_dtype=mxu_dtype)

    per_row_loss = pl.pallas_call(
        kernel,
        out_shape=jax.ShapeDtypeStruct((B, 1), jnp.float32),
        grid_spec=pltpu.PrefetchScalarGridSpec(
            num_scalar_prefetch=0,
            grid=(B // tb, C // tc),                         # (batch tiles, class tiles)
            in_specs=[
                pl.BlockSpec((tb, f_pad), lambda i, j: (i, 0)),  # x tile
                pl.BlockSpec((f_pad, tc), lambda i, j: (0, j)),  # W^T class tile
                pl.BlockSpec((tb, 1), lambda i, j: (i, 0)),      # labels tile
                pl.BlockSpec((tb, 1), lambda i, j: (i, 0)),      # per-row margin
            ],
            out_specs=pl.BlockSpec((tb, 1), lambda i, j: (i, 0)),  # per-row CE
            scratch_shapes=[
                pltpu.VMEM((tb, f_pad), mxu_dtype),          # cached normalized x
                pltpu.VMEM((tb, 1), jnp.float32),            # running max
                pltpu.VMEM((tb, 1), jnp.float32),            # running sum
                pltpu.VMEM((tb, 1), jnp.float32),            # target logit
            ],
        ),
        compiler_params=pltpu.CompilerParams(
            dimension_semantics=("parallel", "arbitrary"),
            vmem_limit_bytes=vmem_limit),
    )(x, w_t, label2d, marg_row)

    loss = jnp.mean(per_row_loss)                            # nn.CrossEntropyLoss mean
    regularizer = -1.0 * lambda_regular * jnp.mean(temp)
    loss = loss + regularizer
    return loss, temp


def _reference_forward(x, weights, margin, label, demog_label,
                       s=64.0, lambda_regular=100.0):
    """Pure-JAX reference mirroring the PyTorch module."""
    x_n = x / jnp.maximum(jnp.linalg.norm(x, axis=1, keepdims=True), 1e-12)
    w_n = weights / jnp.maximum(jnp.linalg.norm(weights, axis=1, keepdims=True), 1e-12)
    cosine = x_n @ w_n.T
    one_hot = jax.nn.one_hot(label, weights.shape[0], dtype=cosine.dtype)
    temp = jnp.exp(margin)
    logits = s * (cosine - one_hot * temp[demog_label][:, None])
    logp = jax.nn.log_softmax(logits, axis=1)
    ce = -jnp.mean(jnp.sum(logp * one_hot, axis=1))
    return ce - lambda_regular * jnp.mean(temp), temp


if __name__ == "__main__":
    nfeatures, nclasses, ndemog = 32, 16, 2
    B = 16
    s_param, lambda_regular = 64.0, 100.0

    key = jax.random.PRNGKey(0)
    kx, kw, kl, kd = jax.random.split(key, 4)

    # Deterministic parameter init (mirrors module __init__):
    #   weights: xavier_uniform_ on (nclasses, nfeatures)
    bound = math.sqrt(6.0 / (nfeatures + nclasses))
    weights = jax.random.uniform(kw, (nclasses, nfeatures),
                                 minval=-bound, maxval=bound, dtype=jnp.float32)
    #   margin: constant log(0.35), shape (ndemog,)
    margin = jnp.full((ndemog,), math.log(0.35), dtype=jnp.float32)

    x = jax.random.normal(kx, (B, nfeatures), dtype=jnp.float32)
    label = jax.random.randint(kl, (B,), 0, nclasses, dtype=jnp.int32)
    demog_label = jax.random.randint(kd, (B,), 0, ndemog, dtype=jnp.int32)

    # f32 MXU inputs for the correctness check (s=64 amplifies bf16 cosine
    # rounding); pass mxu_dtype=jnp.bfloat16 for production speed on v6e/v7x.
    loss, temp = am_softmax_marginatt_forward(
        x, weights, margin, label, demog_label,
        s=s_param, lambda_regular=lambda_regular,
        tb=512, tc=2048, mxu_dtype=jnp.float32)
    jax.block_until_ready((loss, temp))

    ref_loss, ref_temp = _reference_forward(
        x, weights, margin, label, demog_label, s=s_param,
        lambda_regular=lambda_regular)
    assert jnp.allclose(loss, ref_loss, rtol=1e-4, atol=1e-4), (loss, ref_loss)
    assert jnp.allclose(temp, ref_temp, rtol=1e-6, atol=1e-6)

    print("KERNEL_OK")
</pallas_src>

<mosaic_0001>
module attributes {stable_mosaic.version = 11 : i64} {
  func.func @_am_softmax_kernel(%arg0: i32, %arg1: i32, %arg2: memref<16x128xf32, #tpu.memory_space<vmem>>, %arg3: memref<128x16xf32, #tpu.memory_space<vmem>>, %arg4: memref<16x1xi32, #tpu.memory_space<vmem>>, %arg5: memref<16x1xf32, #tpu.memory_space<vmem>>, %arg6: memref<16x1xf32, #tpu.memory_space<vmem>>, %arg7: memref<16x128xf32, #tpu.memory_space<vmem>>, %arg8: memref<16x1xf32, #tpu.memory_space<vmem>>, %arg9: memref<16x1xf32, #tpu.memory_space<vmem>>, %arg10: memref<16x1xf32, #tpu.memory_space<vmem>>) attributes {dimension_semantics = [#tpu.dimension_semantics<parallel>, #tpu.dimension_semantics<arbitrary>], iteration_bounds = array<i64: 1, 1>, scalar_prefetch = 0 : i64, scratch_operands = 4 : i64, tpu.core_type = #tpu.core_type<tc>, window_params = [{transform_indices = @transform_0, window_bounds = array<i64: 16, 128>}, {transform_indices = @transform_1, window_bounds = array<i64: 128, 16>}, {transform_indices = @transform_2, window_bounds = array<i64: 16, 1>}, {transform_indices = @transform_3, window_bounds = array<i64: 16, 1>}, {transform_indices = @transform_4, window_bounds = array<i64: 16, 1>}]} {
    %c0_i32 = arith.constant 0 : i32
    %0 = arith.cmpi eq, %arg1, %c0_i32 : i32
    %1 = arith.extui %0 : i1 to i32
    %c0_i32_0 = arith.constant 0 : i32
    %2 = arith.cmpi ne, %1, %c0_i32_0 : i32
    scf.if %2 {
      %c0_31 = arith.constant 0 : index
      %c0_32 = arith.constant 0 : index
      %50 = vector.load %arg2[%c0_31, %c0_32] : memref<16x128xf32, #tpu.memory_space<vmem>>, vector<16x128xf32>
      %51 = arith.mulf %50, %50 : vector<16x128xf32>
      %cst_33 = arith.constant dense<0.000000e+00> : vector<16xf32>
      %52 = vector.multi_reduction <add>, %51, %cst_33 [1] : vector<16x128xf32> to vector<16xf32>
      %53 = vector.shape_cast %52 : vector<16xf32> to vector<16x1xf32>
      %cst_34 = arith.constant 1.000000e-24 : f32
      %54 = vector.broadcast %cst_34 : f32 to vector<16x1xf32>
      %55 = arith.maximumf %53, %54 : vector<16x1xf32>
      %56 = math.rsqrt %55 : vector<16x1xf32>
      %57 = vector.broadcast %56 : vector<16x1xf32> to vector<16x128xf32>
      %58 = arith.mulf %50, %57 : vector<16x128xf32>
      %c0_35 = arith.constant 0 : index
      %c0_36 = arith.constant 0 : index
      %59 = vector.load %arg7[%c0_35, %c0_36] : memref<16x128xf32, #tpu.memory_space<vmem>>, vector<16x128xf32>
      tpu.vector_store %arg7[%c0_35, %c0_36], %58 {strides = array<i32>} : memref<16x128xf32, #tpu.memory_space<vmem>>, vector<16x128xf32>,
      %cst_37 = arith.constant 0xFF800000 : f32
      %60 = vector.broadcast %cst_37 : f32 to vector<16x1xf32>
      %c0_38 = arith.constant 0 : index
      %c0_39 = arith.constant 0 : index
      %61 = vector.load %arg8[%c0_38, %c0_39] : memref<16x1xf32, #tpu.memory_space<vmem>>, vector<16x1xf32>
      tpu.vector_store %arg8[%c0_38, %c0_39], %60 {strides = array<i32>} : memref<16x1xf32, #tpu.memory_space<vmem>>, vector<16x1xf32>,
      %cst_40 = arith.constant 0.000000e+00 : f32
      %62 = vector.broadcast %cst_40 : f32 to vector<16x1xf32>
      %c0_41 = arith.constant 0 : index
      %c0_42 = arith.constant 0 : index
      %63 = vector.load %arg9[%c0_41, %c0_42] : memref<16x1xf32, #tpu.memory_space<vmem>>, vector<16x1xf32>
      tpu.vector_store %arg9[%c0_41, %c0_42], %62 {strides = array<i32>} : memref<16x1xf32, #tpu.memory_space<vmem>>, vector<16x1xf32>,
      %cst_43 = arith.constant 0.000000e+00 : f32
      %64 = vector.broadcast %cst_43 : f32 to vector<16x1xf32>
      %c0_44 = arith.constant 0 : index
      %c0_45 = arith.constant 0 : index
      %65 = vector.load %arg10[%c0_44, %c0_45] : memref<16x1xf32, #tpu.memory_space<vmem>>, vector<16x1xf32>
      tpu.vector_store %arg10[%c0_44, %c0_45], %64 {strides = array<i32>} : memref<16x1xf32, #tpu.memory_space<vmem>>, vector<16x1xf32>,
    } else {
    }
    %c0 = arith.constant 0 : index
    %c0_1 = arith.constant 0 : index
    %3 = vector.load %arg7[%c0, %c0_1] : memref<16x128xf32, #tpu.memory_space<vmem>>, vector<16x128xf32>
    %c0_2 = arith.constant 0 : index
    %c0_3 = arith.constant 0 : index
    %4 = vector.load %arg3[%c0_2, %c0_3] : memref<128x16xf32, #tpu.memory_space<vmem>>, vector<128x16xf32>
    %cst = arith.constant dense<0.000000e+00> : vector<16x16xf32>
    %5 = tpu.matmul %3, %4, %cst {dimension_numbers = #tpu.dot_dimension_numbers<[1], [0], [0], [1], [0, 0, 1, 1], [], []>} : vector<16x128xf32>, vector<128x16xf32>, vector<16x16xf32> -> vector<16x16xf32>
    %6 = tpu.iota {dimensions = array<i32: 1>} : vector<16x16xi32>
    %c0_4 = arith.constant 0 : index
    %c0_5 = arith.constant 0 : index
    %7 = vector.load %arg4[%c0_4, %c0_5] : memref<16x1xi32, #tpu.memory_space<vmem>>, vector<16x1xi32>
    %c16_i32 = arith.constant 16 : i32
    %8 = arith.muli %arg1, %c16_i32 : i32
    %9 = vector.broadcast %8 : i32 to vector<16x1xi32>
    %10 = arith.subi %7, %9 : vector<16x1xi32>
    %11 = vector.broadcast %10 : vector<16x1xi32> to vector<16x16xi32>
    %12 = arith.cmpi eq, %6, %11 : vector<16x16xi32>
    %cst_6 = arith.constant 6.400000e+01 : f32
    %13 = vector.broadcast %cst_6 : f32 to vector<16x16xf32>
    %14 = arith.mulf %13, %5 : vector<16x16xf32>
    %c0_7 = arith.constant 0 : index
    %c0_8 = arith.constant 0 : index
    %15 = vector.load %arg5[%c0_7, %c0_8] : memref<16x1xf32, #tpu.memory_space<vmem>>, vector<16x1xf32>
    %cst_9 = arith.constant 6.400000e+01 : f32
    %16 = vector.broadcast %cst_9 : f32 to vector<16x1xf32>
    %17 = arith.mulf %16, %15 : vector<16x1xf32>
    %cst_10 = arith.constant 0.000000e+00 : f32
    %18 = vector.shape_cast %17 : vector<16x1xf32> to vector<16x1xf32>
    %19 = vector.broadcast %18 : vector<16x1xf32> to vector<16x16xf32>
    %20 = vector.broadcast %cst_10 : f32 to vector<16x16xf32>
    %21 = arith.select %12, %19, %20 : vector<16x16xi1>, vector<16x16xf32>
    %22 = arith.subf %14, %21 : vector<16x16xf32>
    %cst_11 = arith.constant dense<0xFF800000> : vector<16xf32>
    %23 = vector.multi_reduction <maximumf>, %22, %cst_11 [1] : vector<16x16xf32> to vector<16xf32>
    %24 = vector.shape_cast %23 : vector<16xf32> to vector<16x1xf32>
    %c0_12 = arith.constant 0 : index
    %c0_13 = arith.constant 0 : index
    %25 = vector.load %arg8[%c0_12, %c0_13] : memref<16x1xf32, #tpu.memory_space<vmem>>, vector<16x1xf32>
    %26 = arith.maximumf %25, %24 : vector<16x1xf32>
    %c0_14 = arith.constant 0 : index
    %c0_15 = arith.constant 0 : index
    %27 = vector.load %arg8[%c0_14, %c0_15] : memref<16x1xf32, #tpu.memory_space<vmem>>, vector<16x1xf32>
    %28 = arith.subf %27, %26 : vector<16x1xf32>
    %29 = math.exp %28 : vector<16x1xf32>
    %c0_16 = arith.constant 0 : index
    %c0_17 = arith.constant 0 : index
    %30 = vector.load %arg9[%c0_16, %c0_17] : memref<16x1xf32, #tpu.memory_space<vmem>>, vector<16x1xf32>
    %31 = arith.mulf %29, %30 : vector<16x1xf32>
    %32 = vector.broadcast %26 : vector<16x1xf32> to vector<16x16xf32>
    %33 = arith.subf %22, %32 : vector<16x16xf32>
    %34 = math.exp %33 : vector<16x16xf32>
    %cst_18 = arith.constant dense<0.000000e+00> : vector<16xf32>
    %35 = vector.multi_reduction <add>, %34, %cst_18 [1] : vector<16x16xf32> to vector<16xf32>
    %36 = vector.shape_cast %35 : vector<16xf32> to vector<16x1xf32>
    %37 = arith.addf %31, %36 : vector<16x1xf32>
    %c0_19 = arith.constant 0 : index
    %c0_20 = arith.constant 0 : index
    %38 = vector.load %arg9[%c0_19, %c0_20] : memref<16x1xf32, #tpu.memory_space<vmem>>, vector<16x1xf32>
    tpu.vector_store %arg9[%c0_19, %c0_20], %37 {strides = array<i32>} : memref<16x1xf32, #tpu.memory_space<vmem>>, vector<16x1xf32>,
    %c0_21 = arith.constant 0 : index
    %c0_22 = arith.constant 0 : index
    %39 = vector.load %arg8[%c0_21, %c0_22] : memref<16x1xf32, #tpu.memory_space<vmem>>, vector<16x1xf32>
    tpu.vector_store %arg8[%c0_21, %c0_22], %26 {strides = array<i32>} : memref<16x1xf32, #tpu.memory_space<vmem>>, vector<16x1xf32>,
    %c0_23 = arith.constant 0 : index
    %c0_24 = arith.constant 0 : index
    %40 = vector.load %arg10[%c0_23, %c0_24] : memref<16x1xf32, #tpu.memory_space<vmem>>, vector<16x1xf32>
    %cst_25 = arith.constant 0.000000e+00 : f32
    %41 = vector.broadcast %cst_25 : f32 to vector<16x16xf32>
    %42 = arith.select %12, %22, %41 : vector<16x16xi1>, vector<16x16xf32>
    %cst_26 = arith.constant dense<0.000000e+00> : vector<16xf32>
    %43 = vector.multi_reduction <add>, %42, %cst_26 [1] : vector<16x16xf32> to vector<16xf32>
    %44 = vector.shape_cast %43 : vector<16xf32> to vector<16x1xf32>
    %45 = arith.addf %40, %44 : vector<16x1xf32>
    %c0_27 = arith.constant 0 : index
    %c0_28 = arith.constant 0 : index
    %46 = vector.load %arg10[%c0_27, %c0_28] : memref<16x1xf32, #tpu.memory_space<vmem>>, vector<16x1xf32>
    tpu.vector_store %arg10[%c0_27, %c0_28], %45 {strides = array<i32>} : memref<16x1xf32, #tpu.memory_space<vmem>>, vector<16x1xf32>,
    %c0_i32_29 = arith.constant 0 : i32
    %47 = arith.cmpi eq, %arg1, %c0_i32_29 : i32
    %48 = arith.extui %47 : i1 to i32
    %c0_i32_30 = arith.constant 0 : i32
    %49 = arith.cmpi ne, %48, %c0_i32_30 : i32
    scf.if %49 {
      %c0_31 = arith.constant 0 : index
      %c0_32 = arith.constant 0 : index
      %50 = vector.load %arg8[%c0_31, %c0_32] : memref<16x1xf32, #tpu.memory_space<vmem>>, vector<16x1xf32>
      %c0_33 = arith.constant 0 : index
      %c0_34 = arith.constant 0 : index
      %51 = vector.load %arg9[%c0_33, %c0_34] : memref<16x1xf32, #tpu.memory_space<vmem>>, vector<16x1xf32>
      %52 = math.log %51 : vector<16x1xf32>
      %53 = arith.addf %50, %52 : vector<16x1xf32>
      %c0_35 = arith.constant 0 : index
      %c0_36 = arith.constant 0 : index
      %54 = vector.load %arg10[%c0_35, %c0_36] : memref<16x1xf32, #tpu.memory_space<vmem>>, vector<16x1xf32>
      %55 = arith.subf %53, %54 : vector<16x1xf32>
      %c0_37 = arith.constant 0 : index
      %c0_38 = arith.constant 0 : index
      %56 = vector.load %arg6[%c0_37, %c0_38] : memref<16x1xf32, #tpu.memory_space<vmem>>, vector<16x1xf32>
      tpu.vector_store %arg6[%c0_37, %c0_38], %55 {strides = array<i32>} : memref<16x1xf32, #tpu.memory_space<vmem>>, vector<16x1xf32>,
    } else {
    }
    return
  }
  func.func @transform_0(%arg0: i32, %arg1: i32) -> (i32, i32) {
    %c0_i32 = arith.constant 0 : i32
    %c0_i32_0 = arith.constant 0 : i32
    return %arg0, %c0_i32 : i32, i32
  }
  func.func @transform_1(%arg0: i32, %arg1: i32) -> (i32, i32) {
    %c0_i32 = arith.constant 0 : i32
    %c0_i32_0 = arith.constant 0 : i32
    return %c0_i32, %arg1 : i32, i32
  }
  func.func @transform_2(%arg0: i32, %arg1: i32) -> (i32, i32) {
    %c0_i32 = arith.constant 0 : i32
    %c0_i32_0 = arith.constant 0 : i32
    return %arg0, %c0_i32 : i32, i32
  }
  func.func @transform_3(%arg0: i32, %arg1: i32) -> (i32, i32) {
    %c0_i32 = arith.constant 0 : i32
    %c0_i32_0 = arith.constant 0 : i32
    return %arg0, %c0_i32 : i32, i32
  }
  func.func @transform_4(%arg0: i32, %arg1: i32) -> (i32, i32) {
    %c0_i32 = arith.constant 0 : i32
    %c0_i32_0 = arith.constant 0 : i32
    return %arg0, %c0_i32 : i32, i32
  }
}

</mosaic_0001>

<bundles_post_ra>
// kernel: tpu_custom_call.1
= control target key start
LH: loop header
LB: loop body
LE: loop exit
PB: predicated region body
PF: predicated region fallthrough
CT: control target
= control target key end

     0   :  { %v334_v20 = vmov 0   ;;  %vm37_vm0 = vcmask 7168   ;;  %v335_v35 = vmov -inf   ;;  %v137_v37 = vlaneseq  ;;  %s468_s0 = inlined_call_operand.vmem [shape: f32[16,128], index: 0, kind: input, shape index: {}]   ;;  %s469_s1 = inlined_call_operand.vmem [shape: f32[128,16], index: 1, kind: input, shape index: {}]   ;;  %s470_s2 = inlined_call_operand.vmem [shape: s32[16,1], index: 2, kind: input, shape index: {}]   ;;  %s471_s3 = inlined_call_operand.vmem [shape: f32[16,1], index: 3, kind: input, shape index: {}]   ;;  %s472_s4 = inlined_call_operand.vmem [shape: f32[16,1], index: 4, kind: output, shape index: {}]  }
   0x1   :  { %v365_v0 = vld [vmem:[%s468_s0] sm:$0xff]  ;;  %v370_v1 = vld [vmem:[%s468_s0 + $0x8] sm:$0xff]  ;;  %v61_v2 = vld [vmem:[%s469_s1 + $0x78] sm:$0xff]  ;;  %316 = vset.pattern.permute.xlu1 %v334_v20  ;;  %317 = vset.pattern.permute.xlu0 %v334_v20  ;;  %38 = vst.msk [vmem:[#allocation3] sm:$0xff] %vm37_vm0, %v335_v35  ;;  %vm173_vm3 = vcmask 130048   ;;  %v336_v52 = vmov 0.0  }
   0x2   :  { %v23_v3 = vmul.f32 %v365_v0, %v365_v0  ;;  %278 = vmatprep.subr.mxu0 %v61_v2  ;;  %v60_v4 = vld [vmem:[%s469_s1 + $0x70] sm:$0xff]  ;;  %v59_v5 = vld [vmem:[%s469_s1 + $0x68] sm:$0xff]  ;;  %v24_v6 = vmul.f32 %v370_v1, %v370_v1  ;;  %v58_v7 = vld [vmem:[%s469_s1 + $0x60] sm:$0xff]  ;;  %39 = vst.msk [vmem:[#allocation3 + $0x8] sm:$0xff] %vm37_vm0, %v335_v35  ;;  %v138_v38 = vand.u32 127, %v137_v37 }
   0x3   :  { %279 = vmatpush3.msra.mxu0 %v61_v2  ;;  %v57_v8 = vld [vmem:[%s469_s1 + $0x58] sm:$0xff]  ;;  %v56_v9 = vld [vmem:[%s469_s1 + $0x50] sm:$0xff]  ;;  %v55_v10 = vld [vmem:[%s469_s1 + $0x48] sm:$0xff]  ;;  %40 = vst.msk [vmem:[#allocation4] sm:$0xff] %vm37_vm0, %v336_v52 }
   0x4   :  { %25 = vadd.xlane.f32.xlu0 %v23_v3  ;;  %280 = vmatprep.subr.mxu0 %v60_v4  ;;  %v54_v11 = vld [vmem:[%s469_s1 + $0x40] sm:$0xff]  ;;  %v53_v12 = vld [vmem:[%s469_s1 + $0x38] sm:$0xff]  ;;  %v52_v13 = vld [vmem:[%s469_s1 + $0x30] sm:$0xff]  ;;  %41 = vst.msk [vmem:[#allocation4 + $0x8] sm:$0xff] %vm37_vm0, %v336_v52 }
   0x5   :  { %281 = vmatpush3.msra.mxu0 %v60_v4  ;;  %v51_v14 = vld [vmem:[%s469_s1 + $0x28] sm:$0xff]  ;;  %v50_v15 = vld [vmem:[%s469_s1 + $0x20] sm:$0xff]  ;;  %v49_v16 = vld [vmem:[%s469_s1 + $0x18] sm:$0xff]  ;;  %42 = vst.msk [vmem:[#allocation5] sm:$0xff] %vm37_vm0, %v336_v52 }
   0x6   :  { %282 = vmatprep.subr.mxu0 %v59_v5  ;;  %v48_v17 = vld [vmem:[%s469_s1 + $0x10] sm:$0xff]  ;;  %v47_v18 = vld [vmem:[%s469_s1 + $0x8] sm:$0xff]  ;;  %v46_v19 = vld [vmem:[%s469_s1] sm:$0xff]  ;;  %43 = vst.msk [vmem:[#allocation5 + $0x8] sm:$0xff] %vm37_vm0, %v336_v52 }
   0x7   :  { %283 = vmatpush3.msra.mxu0 %v59_v5  ;;  %v139_v21 = vld [vmem:[%s470_s2] sm:$0xff]  ;;  %v140_v23 = vld [vmem:[%s470_s2 + $0x8] sm:$0xff] }
   0x8   :  { %27 = vadd.xlane.f32.xlu0 %v24_v6  ;;  %284 = vmatprep.subr.mxu0 %v58_v7  ;;  %v155_v22 = vld [vmem:[%s471_s3] sm:$0xff]  ;;  %v156_v24 = vld [vmem:[%s471_s3 + $0x8] sm:$0xff] }
   0x9   :  { %285 = vmatpush3.msra.mxu0 %v58_v7  ;;  %146 = vperm.xlu1 %316, %v139_v21   ;;  %v157_v25 = vmul.f32 64.0, %v155_v22  ;;  %v158_v26 = vmul.f32 64.0, %v156_v24  ;;  %v180_v53 = vld [vmem:[#allocation3] sm:$0xff]  ;;  %v181_v56 = vld [vmem:[#allocation3 + $0x8] sm:$0xff] }
   0xa   :  { %286 = vmatprep.subr.mxu0 %v57_v8 }
   0xb   :  { %287 = vmatpush3.msra.mxu0 %v57_v8 }
   0xc   :  { %288 = vmatprep.subr.mxu0 %v56_v9  ;;  %v223_v20 = vld [vmem:[#allocation5] sm:$0xff] }
   0xd   :  { %289 = vmatpush3.msra.mxu0 %v56_v9  ;;  %149 = vperm.xlu1 %316, %v140_v23  }
   0xe   :  { %290 = vmatprep.subr.mxu0 %v55_v10 }
   0xf   :  { %291 = vmatpush3.msra.mxu0 %v55_v10 }
  0x10   :  { %292 = vmatprep.subr.mxu0 %v54_v11 }
  0x11   :  { %293 = vmatpush3.msra.mxu0 %v54_v11  ;;  %166 = vperm.xlu1 %316, %v158_v26   ;;  %v224_v26 = vld [vmem:[#allocation5 + $0x8] sm:$0xff] }
  0x12   :  { %294 = vmatprep.subr.mxu0 %v53_v12 }
  0x13   :  { %295 = vmatpush3.msra.mxu0 %v53_v12 }
  0x14   :  { %296 = vmatprep.subr.mxu0 %v52_v13 }
  0x15   :  { %297 = vmatpush3.msra.mxu0 %v52_v13 }
  0x16   :  { %298 = vmatprep.subr.mxu0 %v51_v14 }
  0x17   :  { %299 = vmatpush3.msra.mxu0 %v51_v14  ;;  %v190_v14 = vld [vmem:[#allocation4] sm:$0xff] }
  0x18   :  { %300 = vmatprep.subr.mxu0 %v50_v15 }
  0x19   :  { %301 = vmatpush3.msra.mxu0 %v50_v15 }
  0x1a   :  { %302 = vmatprep.subr.mxu0 %v49_v16 }
  0x1b   :  { %303 = vmatpush3.msra.mxu0 %v49_v16 }
  0x1c   :  { %304 = vmatprep.subr.mxu0 %v48_v17 }
  0x1d   :  { %305 = vmatpush3.msra.mxu0 %v48_v17 }
  0x1e   :  { %306 = vmatprep.subr.mxu0 %v47_v18  ;;  %161 = vperm.xlu0 %317, %v157_v25  }
  0x1f   :  { %307 = vmatpush3.msra.mxu0 %v47_v18  ;;  %v191_v18 = vld [vmem:[#allocation4 + $0x8] sm:$0xff] }
  0x20   :  { %308 = vmatprep.subr.mxu0 %v46_v19 }
  0x21   :  { %309 = vmatpush3.msra.mxu0 %v46_v19 }
  0x84   :  { %v147_v36 = vpop.permute.xlu1 %146 }
  0x85   :  { %vm151_vm1 = vcmp.eq.s32.totalorder %v138_v38, %v147_v36 }
  0x88   :  { %v150_v39 = vpop.permute.xlu1 %149 }
  0x89   :  { %vm152_vm2 = vcmp.eq.s32.totalorder %v138_v38, %v150_v39 }
  0x8c   :  { %v167_v43 = vpop.permute.xlu1 %166 }
  0x8d   :  { %v26_v27 = vpop.xlane.xlu0 %25  ;;  %v170_v48 = vsel %vm152_vm2, %v167_v43, 0.0 }
  0x8e   :  { %v29_v28 = vmax.f32 %v26_v27, 1e-24 }
  0x90   :  { %318 = vrsqrt.f32 %v29_v28 }
  0x91   :  { %v28_v29 = vpop.xlane.xlu0 %27 }
  0x92   :  { %v30_v30 = vmax.f32 %v28_v29, 1e-24 }
  0x94   :  { %320 = vrsqrt.f32 %v30_v30 }
  0x99   :  { %v162_v41 = vpop.permute.xlu0 %161 }
  0x9a   :  { %v169_v46 = vsel %vm151_vm1, %v162_v41, 0.0 }
  0x9d   :  { %v319_v31 = vpop.eup %318 }
  0x9e   :  { %v33_v32 = vmul.f32 %v319_v31, %v365_v0 }
  0xa0   :  { %310 = vmatprep.mubr.f32.mxu0 %v33_v32 }
  0xa1   :  { %v321_v33 = vpop.eup %320 }
  0xa2   :  { %v34_v34 = vmul.f32 %v321_v33, %v370_v1 }
  0xa4   :  { %311 = vmatmul.mubr.f32.vlgmr.msra.gmra.mxu0 %v34_v34 }
 0x164   :  { %v312_v40 = vpop.f32.mrf.mxu0 }
 0x165   :  { %v154_v44 = vmul.f32 64.0, %v312_v40 }
 0x166   :  { %v128_v42 = vpop.f32.mrf.mxu0 }
 0x167   :  { %v153_v45 = vmul.f32 64.0, %v128_v42  ;;  %v172_v49 = vsub.f32 %v154_v44, %v170_v48 }
 0x169   :  { %v171_v47 = vsub.f32 %v153_v45, %v169_v46  ;;  %v177_v51 = vsel %vm173_vm3, %v172_v49, -inf  ;;  %v226_v9 = vsel %vm152_vm2, %v172_v49, 0.0 }
 0x16a   :  { %v230_v10 = vsel %vm173_vm3, %v226_v9, 0.0 }
 0x16b   :  { %v174_v50 = vsel %vm173_vm3, %v171_v47, -inf  ;;  %v225_v5 = vsel %vm151_vm1, %v171_v47, 0.0 }
 0x16c   :  { %175 = vmax.xlane.f32.xlu1 %v174_v50  ;;  %v227_v7 = vsel %vm173_vm3, %v225_v5, 0.0 }
 0x170   :  { %178 = vmax.xlane.f32.xlu1 %v177_v51 }
 0x1f5   :  { %v176_v54 = vpop.xlane.xlu1 %175 }
 0x1f6   :  { %v182_v55 = vmax.f32 %v180_v53, %v176_v54 }
 0x1f8   :  { %v184_v57 = vsub.f32 %v180_v53, %v182_v55  ;;  %221 = vst.msk [vmem:[#allocation3] sm:$0xff] %vm37_vm0, %v182_v55  ;;  %196 = vperm.xlu0 %317, %v182_v55  }
 0x1f9   :  { %v179_v58 = vpop.xlane.xlu1 %178 }
 0x1fa   :  { %v183_v59 = vmax.f32 %v181_v56, %v179_v58  ;;  %v186_v11 = vmul.f32 1.442695, %v184_v57 }
 0x1fc   :  { %v185_v60 = vsub.f32 %v181_v56, %v183_v59  ;;  %222 = vst.msk [vmem:[#allocation3 + $0x8] sm:$0xff] %vm37_vm0, %v183_v59  ;;  %201 = vperm.xlu1 %316, %v183_v59  }
 0x1fe   :  { %v188_v12 = vmul.f32 1.442695, %v185_v60 }
 0x1ff   :  { %v240_v33 = vld [vmem:[#allocation3] sm:$0xff] }
 0x203   :  { %v241_v39 = vld [vmem:[#allocation3 + $0x8] sm:$0xff] }
 0x273   :  { %v197_v61 = vpop.permute.xlu0 %196 }
 0x274   :  { %v204_v62 = vsub.f32 %v171_v47, %v197_v61 }
 0x276   :  { %v206_v63 = vmul.f32 1.442695, %v204_v62 }
 0x277   :  { %v202_v0 = vpop.permute.xlu1 %201 }
 0x278   :  { %322 = vpow2.f32 %v206_v63  ;;  %v205_v1 = vsub.f32 %v172_v49, %v202_v0 }
 0x27a   :  { %v208_v2 = vmul.f32 1.442695, %v205_v1 }
 0x27c   :  { %324 = vpow2.f32 %v208_v2 }
 0x27d   :  { %326 = vpow2.f32 %v186_v11 }
 0x27e   :  { %328 = vpow2.f32 %v188_v12 }
 0x285   :  { %v323_v3 = vpop.eup %322 }
 0x286   :  { %v210_v4 = vsel %vm173_vm3, %v323_v3, 0.0 }
 0x287   :  { %211 = vadd.xlane.f32.xlu0 %v210_v4 }
 0x289   :  { %v325_v6 = vpop.eup %324 }
 0x28a   :  { %v213_v8 = vsel %vm173_vm3, %v325_v6, 0.0  ;;  %v327_v13 = vpop.eup %326 }
 0x28b   :  { %228 = vadd.xlane.f32.xlu0 %v227_v7  ;;  %214 = vadd.xlane.f32.xlu1 %v213_v8  ;;  %v192_v15 = vmul.f32 %v327_v13, %v190_v14  ;;  %v329_v16 = vpop.eup %328 }
 0x28c   :  { %v193_v21 = vmul.f32 %v329_v16, %v191_v18 }
 0x28f   :  { %231 = vadd.xlane.f32.xlu0 %v230_v10 }
 0x310   :  { %v212_v17 = vpop.xlane.xlu0 %211 }
 0x311   :  { %v216_v19 = vadd.f32 %v212_v17, %v192_v15 }
 0x313   :  { %219 = vst.msk [vmem:[#allocation4] sm:$0xff] %vm37_vm0, %v216_v19 }
 0x314   :  { %v229_v22 = vpop.xlane.xlu0 %228  ;;  %v215_v23 = vpop.xlane.xlu1 %214 }
 0x315   :  { %v233_v24 = vadd.f32 %v229_v22, %v223_v20  ;;  %v217_v25 = vadd.f32 %v215_v23, %v193_v21 }
 0x317   :  { %235 = vst.msk [vmem:[#allocation5] sm:$0xff] %vm37_vm0, %v233_v24  ;;  %220 = vst.msk [vmem:[#allocation4 + $0x8] sm:$0xff] %vm37_vm0, %v217_v25 }
 0x318   :  { %v232_v27 = vpop.xlane.xlu0 %231 }
 0x319   :  { %v234_v28 = vadd.f32 %v232_v27, %v224_v26 }
 0x31a   :  { %v242_v29 = vld [vmem:[#allocation4] sm:$0xff] }
 0x31b   :  { %330 = vlog2.f32 %v242_v29  ;;  %236 = vst.msk [vmem:[#allocation5 + $0x8] sm:$0xff] %vm37_vm0, %v234_v28 }
 0x31e   :  { %v243_v30 = vld [vmem:[#allocation4 + $0x8] sm:$0xff]  ;;  %v250_v36 = vld [vmem:[#allocation5] sm:$0xff] }
 0x31f   :  { %332 = vlog2.f32 %v243_v30 }
 0x322   :  { %v251_v41 = vld [vmem:[#allocation5 + $0x8] sm:$0xff] }
 0x328   :  { %v331_v31 = vpop.eup %330 }
 0x329   :  { %v245_v32 = vmul.f32 0.6931472, %v331_v31 }
 0x32b   :  { %v248_v34 = vadd.f32 %v245_v32, %v240_v33 }
 0x32c   :  { %v333_v35 = vpop.eup %332 }
 0x32d   :  { %v252_v37 = vsub.f32 %v248_v34, %v250_v36  ;;  %v247_v38 = vmul.f32 0.6931472, %v333_v35 }
 0x32f   :  { %254 = vst.msk [vmem:[%s472_s4] sm:$0xff] %vm37_vm0, %v252_v37  ;;  %v249_v40 = vadd.f32 %v247_v38, %v241_v39 }
 0x331   :  { %v253_v42 = vsub.f32 %v249_v40, %v251_v41 }
 0x333   :  { %255 = vst.msk [vmem:[%s472_s4 + $0x8] sm:$0xff] %vm37_vm0, %v253_v42 }

</bundles_post_ra>
